<compile_context>
chip_gen: v6e
topology: v6e:2x2x1
jax: 0.10.0
libtpu: 0.0.40
codegen_flags: <defaults>
</compile_context>

<pallas_src>
import math
import numpy as np
import jax
import jax.numpy as jnp
from jax import lax
from jax.experimental import pallas as pl
from jax.experimental.pallas import tpu as pltpu

# Hyperparameters (CriMLPNetwork defaults, small feature count / batch).
IN_DIM = 16        # in_dim
EMBED_DIM = 8      # embedding_dim
NUM_BINS = 1100    # num_bins
MN = -1.0
MX = 300.0
BATCH = 8
NEG_INF = -1e30


def crimlp_kernel(emb_ref, wqkvT_ref, bqkv_ref, mask_ref, wbig_ref, selbT_ref,
                  btil_ref, out_ref):
    E = emb_ref.shape[-1]
    e2d = emb_ref[0]                                                   # [F*B, E]

    # ONE fused, pre-scaled QKV in-projection matmul: [128, 8] @ [8, 24].
    qkv = jnp.dot(e2d, wqkvT_ref[...],
                  preferred_element_type=jnp.float32) + bqkv_ref[...]  # [F*B, 3E]
    q = qkv[:, 0:E]              # 1/sqrt(E) already folded into W_q / b_q
    k = qkv[:, E:2 * E]
    v = qkv[:, 2 * E:3 * E]

    # Lane-dense block-diagonal attention on the full 128x128 score tile:
    # S = Q K^T via dot_general contracting dim 1 of both (no K^T materialized).
    s = lax.dot_general(q, k, (((1,), (1,)), ((), ())),
                        preferred_element_type=jnp.float32)            # [FB, FB]
    s = s + mask_ref[...]                 # -1e30 off the per-feature 8x8 blocks
    s = s - jnp.max(s, axis=-1, keepdims=True)
    p = jnp.exp(s)
    l = jnp.sum(p, axis=-1, keepdims=True)                             # [FB, 1]
    ctx = jnp.dot(p, v, preferred_element_type=jnp.float32) / l        # [FB, E]

    # Folded (out_proj o Linear(F*E, 1)) epilogue:
    #   out[b] = sum_{f,e} ctx[f*B+b, e] * w_tilde[f, e] + b_tilde
    prod = ctx * wbig_ref[...]                                         # [FB, E]
    red = jnp.dot(selbT_ref[...], prod,
                  preferred_element_type=jnp.float32)                  # [B, E]
    out_ref[0] = jnp.sum(red, axis=1, keepdims=True) + btil_ref[...]   # [B, 1]


def discretize_uniform(x_clamped):
    """torch.bucketize(x, torch.linspace(MN, MX, NUM_BINS), right=False) for the
    uniform bins, in closed form: smallest i with MN + i*step >= x (left tie).
    Input must already be clamped to [MN, MX]."""
    step = (MX - MN) / (NUM_BINS - 1)
    idx = jnp.ceil((x_clamped - MN) / step).astype(jnp.int32)
    return jnp.clip(idx, 0, NUM_BINS - 1)


def _block_diag_mask(F, B):
    f = np.arange(F * B) // B
    return jnp.asarray(
        np.where(f[:, None] == f[None, :], 0.0, NEG_INF).astype(np.float32))


@jax.jit
def crimlp_forward_stacked(x, emb, in_proj_w, in_proj_b, out_proj_w, out_proj_b,
                           lin_w, lin_b):
    """x: [G, B, F] -- G independent micro-batches; attention runs within each
    micro-batch (one CriMLPNetwork.forward call each). Returns [G, B, 1]."""
    G, B, F = x.shape
    E = EMBED_DIM
    FB = F * B

    # ---- trace-time weight folding (constant-folded / fused under jit) -------
    scale = 1.0 / math.sqrt(E)
    col_scale = jnp.concatenate([jnp.full((E,), scale, jnp.float32),
                                 jnp.ones((2 * E,), jnp.float32)])
    wqkvT = in_proj_w.T * col_scale[None, :]          # [E, 3E], Q columns scaled
    bqkv = (in_proj_b * col_scale).reshape(1, 3 * E)

    lin_fe = lin_w.reshape(F, E)
    w_tilde = lin_fe @ out_proj_w                                  # [F, E]
    b_tilde = lin_b.reshape(()) + jnp.sum(lin_fe @ out_proj_b)     # scalar
    wbig = jnp.repeat(w_tilde, B, axis=0)                          # [F*B, E]
    selbT = jnp.tile(jnp.eye(B, dtype=jnp.float32), (1, F))        # [B, F*B]
    btil = b_tilde.reshape(1, 1)
    mask = _block_diag_mask(F, B)                                  # [F*B, F*B]

    # ---- clamp + closed-form bucketize + feature-major embedding gather ------
    # TODO(synk): the 563 KiB table could live in VMEM with scalar-prefetched
    # indices for an in-kernel gather; one fused XLA gather is kept instead
    # since a 128-row serial in-kernel gather would not be faster.
    xc = jnp.clip(jnp.transpose(x, (0, 2, 1)).astype(jnp.float32), MN, MX)  # [G,F,B]
    idx = discretize_uniform(xc)                                            # [G,F,B]
    emb_fm = emb[jnp.arange(F)[None, :, None], idx].reshape(G, FB, E)       # [G,FB,E]

    return pl.pallas_call(
        crimlp_kernel,
        out_shape=jax.ShapeDtypeStruct((G, B, 1), jnp.float32),
        grid_spec=pltpu.PrefetchScalarGridSpec(
            num_scalar_prefetch=0,
            grid=(G,),
            in_specs=[
                pl.BlockSpec((1, FB, E), lambda g: (g, 0, 0)),     # activations
                pl.BlockSpec((E, 3 * E), lambda g: (0, 0)),        # fused QKV W^T
                pl.BlockSpec((1, 3 * E), lambda g: (0, 0)),        # fused QKV bias
                pl.BlockSpec((FB, FB), lambda g: (0, 0)),          # block-diag mask
                pl.BlockSpec((FB, E), lambda g: (0, 0)),           # folded weight
                pl.BlockSpec((B, FB), lambda g: (0, 0)),           # batch selector
                pl.BlockSpec((1, 1), lambda g: (0, 0)),            # folded bias
            ],
            out_specs=pl.BlockSpec((1, B, 1), lambda g: (g, 0, 0)),
        ),
        compiler_params=pltpu.CompilerParams(
            dimension_semantics=("parallel",)),
    )(emb_fm, wqkvT, bqkv, mask, wbig, selbT, btil)


def crimlp_forward(x, *params):
    """Single micro-batch, matching CriMLPNetwork.forward: x [B, F] -> [B, 1]."""
    return crimlp_forward_stacked(x[None], *params)[0]


def reference_forward(x, emb, in_proj_w, in_proj_b, out_proj_w, out_proj_b,
                      lin_w, lin_b):
    """Pure-JAX, unfused replica of the PyTorch forward (for verification)."""
    B, F = x.shape
    E = EMBED_DIM
    xc = jnp.clip(x.astype(jnp.float32), MN, MX)
    idx = discretize_uniform(xc)                                  # [B, F]
    x_emb = emb[jnp.arange(F)[None, :], idx]                      # [B, F, E]

    wq, wk, wv = in_proj_w[:E], in_proj_w[E:2 * E], in_proj_w[2 * E:]
    bq, bk, bv = in_proj_b[:E], in_proj_b[E:2 * E], in_proj_b[2 * E:]
    q = x_emb @ wq.T + bq
    k = x_emb @ wk.T + bk
    v = x_emb @ wv.T + bv
    # MHA batch_first=False: (L=B, N=F, E) -> attention over the batch axis.
    qt = jnp.transpose(q, (1, 0, 2))
    kt = jnp.transpose(k, (1, 0, 2))
    vt = jnp.transpose(v, (1, 0, 2))
    s = jnp.einsum('fbe,fce->fbc', qt, kt) / math.sqrt(E)
    p = jax.nn.softmax(s, axis=-1)
    ctx = jnp.einsum('fbc,fce->fbe', p, vt)
    ctx = jnp.transpose(ctx, (1, 0, 2))                           # [B, F, E]
    attn_out = ctx @ out_proj_w.T + out_proj_b                    # [B, F, E]
    rs = attn_out.reshape(B, F * E)
    return rs @ lin_w.T + lin_b                                   # [B, 1]


if __name__ == "__main__":
    key = jax.random.PRNGKey(0)
    ks = jax.random.split(key, 9)

    emb = (jax.random.normal(ks[0], (IN_DIM, NUM_BINS, EMBED_DIM)) * 0.1).astype(jnp.float32)
    in_proj_w = (jax.random.normal(ks[1], (3 * EMBED_DIM, EMBED_DIM)) * 0.3).astype(jnp.float32)
    in_proj_b = (jax.random.normal(ks[2], (3 * EMBED_DIM,)) * 0.1).astype(jnp.float32)
    out_proj_w = (jax.random.normal(ks[3], (EMBED_DIM, EMBED_DIM)) * 0.3).astype(jnp.float32)
    out_proj_b = (jax.random.normal(ks[4], (EMBED_DIM,)) * 0.1).astype(jnp.float32)
    lin_w = (jax.random.normal(ks[5], (1, IN_DIM * EMBED_DIM)) * 0.1).astype(jnp.float32)
    lin_b = (jax.random.normal(ks[6], (1,)) * 0.1).astype(jnp.float32)
    params = (emb, in_proj_w, in_proj_b, out_proj_w, out_proj_b, lin_w, lin_b)

    # Single micro-batch (module call signature); inputs exercise both clamp ends.
    x = jax.random.uniform(ks[7], (BATCH, IN_DIM), jnp.float32,
                           minval=-5.0, maxval=320.0)
    out = jax.block_until_ready(crimlp_forward(x, *params))
    ref = jax.block_until_ready(reference_forward(x, *params))
    assert out.shape == (BATCH, 1)
    assert np.allclose(np.asarray(out), np.asarray(ref), atol=2e-4, rtol=1e-4), (
        np.max(np.abs(np.asarray(out) - np.asarray(ref))))

    # Stacked independent micro-batches exercising the "parallel" grid axis.
    G = 2
    xs = jax.random.uniform(ks[8], (G, BATCH, IN_DIM), jnp.float32,
                            minval=-5.0, maxval=320.0)
    outs = jax.block_until_ready(crimlp_forward_stacked(xs, *params))
    refs = jnp.stack([reference_forward(xs[g], *params) for g in range(G)])
    assert outs.shape == (G, BATCH, 1)
    assert np.allclose(np.asarray(outs), np.asarray(refs), atol=2e-4, rtol=1e-4), (
        np.max(np.abs(np.asarray(outs) - np.asarray(refs))))

    print("KERNEL_OK")
</pallas_src>

<mosaic_0001>
module attributes {stable_mosaic.version = 11 : i64} {
  func.func @crimlp_kernel(%arg0: i32, %arg1: memref<1x128x8xf32, #tpu.memory_space<vmem>>, %arg2: memref<8x24xf32, #tpu.memory_space<vmem>>, %arg3: memref<1x24xf32, #tpu.memory_space<vmem>>, %arg4: memref<128x128xf32, #tpu.memory_space<vmem>>, %arg5: memref<128x8xf32, #tpu.memory_space<vmem>>, %arg6: memref<8x128xf32, #tpu.memory_space<vmem>>, %arg7: memref<1x1xf32, #tpu.memory_space<vmem>>, %arg8: memref<1x8x1xf32, #tpu.memory_space<vmem>>) attributes {dimension_semantics = [#tpu.dimension_semantics<parallel>], iteration_bounds = array<i64: 1>, scalar_prefetch = 0 : i64, scratch_operands = 0 : i64, tpu.core_type = #tpu.core_type<tc>, window_params = [{transform_indices = @transform_0, window_bounds = array<i64: 1, 128, 8>}, {pipeline_mode = #tpu.pipeline_mode<synchronous>, transform_indices = @transform_1, window_bounds = array<i64: 8, 24>}, {pipeline_mode = #tpu.pipeline_mode<synchronous>, transform_indices = @transform_2, window_bounds = array<i64: 1, 24>}, {pipeline_mode = #tpu.pipeline_mode<synchronous>, transform_indices = @transform_3, window_bounds = array<i64: 128, 128>}, {pipeline_mode = #tpu.pipeline_mode<synchronous>, transform_indices = @transform_4, window_bounds = array<i64: 128, 8>}, {pipeline_mode = #tpu.pipeline_mode<synchronous>, transform_indices = @transform_5, window_bounds = array<i64: 8, 128>}, {pipeline_mode = #tpu.pipeline_mode<synchronous>, transform_indices = @transform_6, window_bounds = array<i64: 1, 1>}, {transform_indices = @transform_7, window_bounds = array<i64: 1, 8, 1>}]} {
    %c0 = arith.constant 0 : index
    %c0_0 = arith.constant 0 : index
    %c0_1 = arith.constant 0 : index
    %0 = vector.load %arg1[%c0, %c0_0, %c0_1] : memref<1x128x8xf32, #tpu.memory_space<vmem>>, vector<1x128x8xf32>
    %1 = vector.shape_cast %0 : vector<1x128x8xf32> to vector<128x8xf32>
    %c0_2 = arith.constant 0 : index
    %c0_3 = arith.constant 0 : index
    %2 = vector.load %arg2[%c0_2, %c0_3] : memref<8x24xf32, #tpu.memory_space<vmem>>, vector<8x24xf32>
    %cst = arith.constant dense<0.000000e+00> : vector<128x24xf32>
    %3 = tpu.matmul %1, %2, %cst {dimension_numbers = #tpu.dot_dimension_numbers<[1], [0], [0], [1], [0, 0, 1, 1], [], []>} : vector<128x8xf32>, vector<8x24xf32>, vector<128x24xf32> -> vector<128x24xf32>
    %c0_4 = arith.constant 0 : index
    %c0_5 = arith.constant 0 : index
    %4 = vector.load %arg3[%c0_4, %c0_5] : memref<1x24xf32, #tpu.memory_space<vmem>>, vector<1x24xf32>
    %5 = vector.broadcast %4 : vector<1x24xf32> to vector<128x24xf32>
    %6 = arith.addf %3, %5 : vector<128x24xf32>
    %7 = vector.extract_strided_slice %6 {offsets = [0, 0], sizes = [128, 8], strides = [1, 1]} : vector<128x24xf32> to vector<128x8xf32>
    %8 = vector.extract_strided_slice %6 {offsets = [0, 8], sizes = [128, 8], strides = [1, 1]} : vector<128x24xf32> to vector<128x8xf32>
    %9 = vector.extract_strided_slice %6 {offsets = [0, 16], sizes = [128, 8], strides = [1, 1]} : vector<128x24xf32> to vector<128x8xf32>
    %cst_6 = arith.constant dense<0.000000e+00> : vector<128x128xf32>
    %10 = tpu.matmul %7, %8, %cst_6 {dimension_numbers = #tpu.dot_dimension_numbers<[1], [1], [0], [0], [0, 0, 1, 0], [], []>} : vector<128x8xf32>, vector<128x8xf32>, vector<128x128xf32> -> vector<128x128xf32>
    %c0_7 = arith.constant 0 : index
    %c0_8 = arith.constant 0 : index
    %11 = vector.load %arg4[%c0_7, %c0_8] : memref<128x128xf32, #tpu.memory_space<vmem>>, vector<128x128xf32>
    %12 = arith.addf %10, %11 : vector<128x128xf32>
    %cst_9 = arith.constant dense<0xFF800000> : vector<128xf32>
    %13 = vector.multi_reduction <maximumf>, %12, %cst_9 [1] : vector<128x128xf32> to vector<128xf32>
    %14 = vector.shape_cast %13 : vector<128xf32> to vector<128x1xf32>
    %15 = vector.broadcast %14 : vector<128x1xf32> to vector<128x128xf32>
    %16 = arith.subf %12, %15 : vector<128x128xf32>
    %17 = math.exp %16 : vector<128x128xf32>
    %cst_10 = arith.constant dense<0.000000e+00> : vector<128xf32>
    %18 = vector.multi_reduction <add>, %17, %cst_10 [1] : vector<128x128xf32> to vector<128xf32>
    %19 = vector.shape_cast %18 : vector<128xf32> to vector<128x1xf32>
    %cst_11 = arith.constant dense<0.000000e+00> : vector<128x8xf32>
    %20 = tpu.matmul %17, %9, %cst_11 {dimension_numbers = #tpu.dot_dimension_numbers<[1], [0], [0], [1], [0, 0, 1, 1], [], []>} : vector<128x128xf32>, vector<128x8xf32>, vector<128x8xf32> -> vector<128x8xf32>
    %21 = vector.broadcast %19 : vector<128x1xf32> to vector<128x8xf32>
    %22 = arith.divf %20, %21 : vector<128x8xf32>
    %c0_12 = arith.constant 0 : index
    %c0_13 = arith.constant 0 : index
    %23 = vector.load %arg5[%c0_12, %c0_13] : memref<128x8xf32, #tpu.memory_space<vmem>>, vector<128x8xf32>
    %24 = arith.mulf %22, %23 : vector<128x8xf32>
    %c0_14 = arith.constant 0 : index
    %c0_15 = arith.constant 0 : index
    %25 = vector.load %arg6[%c0_14, %c0_15] : memref<8x128xf32, #tpu.memory_space<vmem>>, vector<8x128xf32>
    %cst_16 = arith.constant dense<0.000000e+00> : vector<8x8xf32>
    %26 = tpu.matmul %25, %24, %cst_16 {dimension_numbers = #tpu.dot_dimension_numbers<[1], [0], [0], [1], [0, 0, 1, 1], [], []>} : vector<8x128xf32>, vector<128x8xf32>, vector<8x8xf32> -> vector<8x8xf32>
    %cst_17 = arith.constant dense<0.000000e+00> : vector<8xf32>
    %27 = vector.multi_reduction <add>, %26, %cst_17 [1] : vector<8x8xf32> to vector<8xf32>
    %28 = vector.shape_cast %27 : vector<8xf32> to vector<8x1xf32>
    %c0_18 = arith.constant 0 : index
    %c0_19 = arith.constant 0 : index
    %29 = vector.load %arg7[%c0_18, %c0_19] : memref<1x1xf32, #tpu.memory_space<vmem>>, vector<1x1xf32>
    %30 = vector.broadcast %29 : vector<1x1xf32> to vector<8x1xf32>
    %31 = arith.addf %28, %30 : vector<8x1xf32>
    %c0_20 = arith.constant 0 : index
    %c0_21 = arith.constant 0 : index
    %c0_22 = arith.constant 0 : index
    %32 = vector.load %arg8[%c0_20, %c0_21, %c0_22] : memref<1x8x1xf32, #tpu.memory_space<vmem>>, vector<1x8x1xf32>
    %33 = vector.shape_cast %32 : vector<1x8x1xf32> to vector<8x1xf32>
    %34 = vector.shape_cast %31 : vector<8x1xf32> to vector<1x8x1xf32>
    tpu.vector_store %arg8[%c0_20, %c0_21, %c0_22], %34 {strides = array<i32>} : memref<1x8x1xf32, #tpu.memory_space<vmem>>, vector<1x8x1xf32>,
    return
  }
  func.func @transform_0(%arg0: i32) -> (i32, i32, i32) {
    %c0_i32 = arith.constant 0 : i32
    %c0_i32_0 = arith.constant 0 : i32
    %c0_i32_1 = arith.constant 0 : i32
    return %arg0, %c0_i32, %c0_i32_0 : i32, i32, i32
  }
  func.func @transform_1(%arg0: i32) -> (i32, i32) {
    %c0_i32 = arith.constant 0 : i32
    %c0_i32_0 = arith.constant 0 : i32
    %c0_i32_1 = arith.constant 0 : i32
    return %c0_i32, %c0_i32_0 : i32, i32
  }
  func.func @transform_2(%arg0: i32) -> (i32, i32) {
    %c0_i32 = arith.constant 0 : i32
    %c0_i32_0 = arith.constant 0 : i32
    %c0_i32_1 = arith.constant 0 : i32
    return %c0_i32, %c0_i32_0 : i32, i32
  }
  func.func @transform_3(%arg0: i32) -> (i32, i32) {
    %c0_i32 = arith.constant 0 : i32
    %c0_i32_0 = arith.constant 0 : i32
    %c0_i32_1 = arith.constant 0 : i32
    return %c0_i32, %c0_i32_0 : i32, i32
  }
  func.func @transform_4(%arg0: i32) -> (i32, i32) {
    %c0_i32 = arith.constant 0 : i32
    %c0_i32_0 = arith.constant 0 : i32
    %c0_i32_1 = arith.constant 0 : i32
    return %c0_i32, %c0_i32_0 : i32, i32
  }
  func.func @transform_5(%arg0: i32) -> (i32, i32) {
    %c0_i32 = arith.constant 0 : i32
    %c0_i32_0 = arith.constant 0 : i32
    %c0_i32_1 = arith.constant 0 : i32
    return %c0_i32, %c0_i32_0 : i32, i32
  }
  func.func @transform_6(%arg0: i32) -> (i32, i32) {
    %c0_i32 = arith.constant 0 : i32
    %c0_i32_0 = arith.constant 0 : i32
    %c0_i32_1 = arith.constant 0 : i32
    return %c0_i32, %c0_i32_0 : i32, i32
  }
  func.func @transform_7(%arg0: i32) -> (i32, i32, i32) {
    %c0_i32 = arith.constant 0 : i32
    %c0_i32_0 = arith.constant 0 : i32
    %c0_i32_1 = arith.constant 0 : i32
    return %arg0, %c0_i32, %c0_i32_0 : i32, i32, i32
  }
}

</mosaic_0001>

<bundles_post_ra>
// kernel: tile.9
= control target key start
LH: loop header
LB: loop body
LE: loop exit
PB: predicated region body
PF: predicated region fallthrough
CT: control target
= control target key end

     0   :  { %vm6_vm0 = vcmask 1043458   ;;  %vm10_vm1 = vcmask 1045508   ;;  %vm14_vm2 = vcmask 1047558   ;;  %s19_s6 = smov 3  ;;  %s22_s7 = smov 12  ;;  %vm16_vm3 = vcmask 64512   ;;  %s736_s0 = inlined_call_operand.vmem [shape: f32[8,16,8], index: 0, kind: input, shape index: {}]   ;;  %s737_s1 = inlined_call_operand.vmem [shape: f32[8,128], index: 1, kind: output, shape index: {}]  }
   0x1   :  { %v348_v0 = vld [vmem:[%s736_s0 + $0xf] ss:$16 sm:%s19_s6]   ;;  %s27_s12 = smov 48  ;;  %s32_s13 = smov 192  ;;  %vm38_vm4 = vcmask 1048512   ;;  %vm60_vm5 = vcmask 982912  }
   0x2   :  { %v349_v1 = vld [vmem:[%s736_s0 + $0xf] ss:$16 sm:%s22_s7]   ;;  %s63_s18 = smov 3  ;;  %s66_s21 = smov 12  ;;  %vm82_vm6 = vcmask 917312   ;;  %vm104_vm7 = vcmask 851712  }
   0x3   :  { %v25_v2 = vsel %vm6_vm0, %v349_v1, %v348_v0  ;;  %v350_v3 = vld [vmem:[%s736_s0 + $0xf] ss:$16 sm:%s27_s12]   ;;  %v356_v6 = vld [vmem:[%s736_s0 + $0xd] ss:$16 sm:%s63_s18]   ;;  %s71_s22 = smov 48  ;;  %s76_s27 = smov 192 }
   0x4   :  { %v351_v4 = vld [vmem:[%s736_s0 + $0xf] ss:$16 sm:%s32_s13]   ;;  %v30_v5 = vsel %vm10_vm1, %v350_v3, %v25_v2  ;;  %v357_v8 = vld [vmem:[%s736_s0 + $0xd] ss:$16 sm:%s66_s21]   ;;  %s423_s28 = smov 120   ;;  %s41_s2 = smov 3 }
   0x5   :  { %v35_v7 = vsel %vm14_vm2, %v351_v4, %v30_v5  ;;  %v358_v9 = vld [vmem:[%s736_s0 + $0xd] ss:$16 sm:%s71_s22]   ;;  %v69_v10 = vsel %vm6_vm0, %v357_v8, %v356_v6  ;;  %s44_s3 = smov 12  ;;  %v352_v13 = vld [vmem:[%s736_s0 + $0xe] ss:$16 sm:%s41_s2]   ;;  %s49_s8 = smov 48 }
   0x6   :  { %36 = vrot.lane.b32.xlu0 %v35_v7, %s423_s28  ;;  %v359_v11 = vld [vmem:[%s736_s0 + $0xd] ss:$16 sm:%s76_s27]   ;;  %v74_v12 = vsel %vm10_vm1, %v358_v9, %v69_v10  ;;  %s54_s9 = smov 192  ;;  %s85_s14 = smov 3  ;;  %vm126_vm8 = vcmask 786112   ;;  %vm148_vm9 = vcmask 720512  }
   0x7   :  { %v353_v14 = vld [vmem:[%s736_s0 + $0xe] ss:$16 sm:%s44_s3]   ;;  %v79_v15 = vsel %vm14_vm2, %v359_v11, %v74_v12  ;;  %s424_s15 = smov 104   ;;  %v360_v20 = vld [vmem:[%s736_s0 + $0xc] ss:$16 sm:%s85_s14]   ;;  %s88_s18 = smov 12 }
   0x8   :  { %v47_v16 = vsel %vm6_vm0, %v353_v14, %v352_v13  ;;  %v354_v17 = vld [vmem:[%s736_s0 + $0xe] ss:$16 sm:%s49_s8]   ;;  %80 = vrot.lane.b32.xlu1 %v79_v15, %s424_s15  ;;  %s93_s19 = smov 48  ;;  %s98_s24 = smov 192  ;;  %vm170_vm10 = vcmask 654912   ;;  %vm192_vm11 = vcmask 589312  }
   0x9   :  { %v355_v18 = vld [vmem:[%s736_s0 + $0xe] ss:$16 sm:%s54_s9]   ;;  %v52_v19 = vsel %vm10_vm1, %v354_v17, %v47_v16  ;;  %v361_v22 = vld [vmem:[%s736_s0 + $0xc] ss:$16 sm:%s88_s18]   ;;  %s425_s25 = smov 112   ;;  %s107_s28 = smov 3 }
   0xa   :  { %v57_v21 = vsel %vm14_vm2, %v355_v18, %v52_v19  ;;  %v362_v23 = vld [vmem:[%s736_s0 + $0xc] ss:$16 sm:%s93_s19]   ;;  %v91_v24 = vsel %vm6_vm0, %v361_v22, %v360_v20  ;;  %s110_s29 = smov 12  ;;  %v364_v27 = vld [vmem:[%s736_s0 + $0xb] ss:$16 sm:%s107_s28]   ;;  %s115_s5 = smov 48 }
   0xb   :  { %58 = vrot.lane.b32.xlu0 %v57_v21, %s425_s25  ;;  %v363_v25 = vld [vmem:[%s736_s0 + $0xc] ss:$16 sm:%s98_s24]   ;;  %v96_v26 = vsel %vm10_vm1, %v362_v23, %v91_v24  ;;  %s120_s6 = smov 192  ;;  %s129_s11 = smov 3  ;;  %vm214_vm12 = vcmask 523712   ;;  %vm236_vm13 = vcmask 458112  }
   0xc   :  { %v365_v28 = vld [vmem:[%s736_s0 + $0xb] ss:$16 sm:%s110_s29]   ;;  %v101_v29 = vsel %vm14_vm2, %v363_v25, %v96_v26  ;;  %s426_s12 = smov 96   ;;  %v368_v34 = vld [vmem:[%s736_s0 + $0xa] ss:$16 sm:%s129_s11]   ;;  %s132_s15 = smov 12 }
   0xd   :  { %v113_v30 = vsel %vm6_vm0, %v365_v28, %v364_v27  ;;  %v366_v31 = vld [vmem:[%s736_s0 + $0xb] ss:$16 sm:%s115_s5]   ;;  %102 = vrot.lane.b32.xlu1 %v101_v29, %s426_s12  ;;  %s137_s16 = smov 48  ;;  %s142_s21 = smov 192  ;;  %vm258_vm14 = vcmask 392512   ;;  %vm280_vm15 = vcmask 326912  }
   0xe   :  { %v367_v32 = vld [vmem:[%s736_s0 + $0xb] ss:$16 sm:%s120_s6]   ;;  %v118_v33 = vsel %vm10_vm1, %v366_v31, %v113_v30  ;;  %v369_v36 = vld [vmem:[%s736_s0 + $0xa] ss:$16 sm:%s132_s15]   ;;  %s427_s22 = smov 88   ;;  %s151_s25 = smov 3 }
   0xf   :  { %v123_v35 = vsel %vm14_vm2, %v367_v32, %v118_v33  ;;  %v370_v37 = vld [vmem:[%s736_s0 + $0xa] ss:$16 sm:%s137_s16]   ;;  %v135_v38 = vsel %vm6_vm0, %v369_v36, %v368_v34  ;;  %s154_s26 = smov 12  ;;  %v372_v41 = vld [vmem:[%s736_s0 + $0x9] ss:$16 sm:%s151_s25]   ;;  %s159_s2 = smov 48 }
  0x10   :  { %124 = vrot.lane.b32.xlu0 %v123_v35, %s427_s22  ;;  %v371_v39 = vld [vmem:[%s736_s0 + $0xa] ss:$16 sm:%s142_s21]   ;;  %v140_v40 = vsel %vm10_vm1, %v370_v37, %v135_v38  ;;  %s164_s3 = smov 192  ;;  %s173_s8 = smov 3 }
  0x11   :  { %v373_v42 = vld [vmem:[%s736_s0 + $0x9] ss:$16 sm:%s154_s26]   ;;  %v145_v43 = vsel %vm14_vm2, %v371_v39, %v140_v40  ;;  %s428_s9 = smov 80   ;;  %v376_v48 = vld [vmem:[%s736_s0 + $0x8] ss:$16 sm:%s173_s8]   ;;  %s176_s12 = smov 12 }
  0x12   :  { %v157_v44 = vsel %vm6_vm0, %v373_v42, %v372_v41  ;;  %v374_v45 = vld [vmem:[%s736_s0 + $0x9] ss:$16 sm:%s159_s2]   ;;  %146 = vrot.lane.b32.xlu1 %v145_v43, %s428_s9  ;;  %s181_s13 = smov 48  ;;  %s186_s18 = smov 192 }
  0x13   :  { %v375_v46 = vld [vmem:[%s736_s0 + $0x9] ss:$16 sm:%s164_s3]   ;;  %v162_v47 = vsel %vm10_vm1, %v374_v45, %v157_v44  ;;  %v377_v50 = vld [vmem:[%s736_s0 + $0x8] ss:$16 sm:%s176_s12]   ;;  %s429_s19 = smov 72   ;;  %s195_s22 = smov 3 }
  0x14   :  { %v167_v49 = vsel %vm14_vm2, %v375_v46, %v162_v47  ;;  %v378_v51 = vld [vmem:[%s736_s0 + $0x8] ss:$16 sm:%s181_s13]   ;;  %v179_v52 = vsel %vm6_vm0, %v377_v50, %v376_v48  ;;  %s198_s23 = smov 12  ;;  %v380_v55 = vld [vmem:[%s736_s0 + $0x7] ss:$16 sm:%s195_s22]   ;;  %s203_s28 = smov 48 }
  0x15   :  { %168 = vrot.lane.b32.xlu0 %v167_v49, %s429_s19  ;;  %v379_v53 = vld [vmem:[%s736_s0 + $0x8] ss:$16 sm:%s186_s18]   ;;  %v184_v54 = vsel %vm10_vm1, %v378_v51, %v179_v52  ;;  %s208_s29 = smov 192  ;;  %s217_s5 = smov 3 }
  0x16   :  { %v381_v56 = vld [vmem:[%s736_s0 + $0x7] ss:$16 sm:%s198_s23]   ;;  %v189_v57 = vsel %vm14_vm2, %v379_v53, %v184_v54  ;;  %s430_s6 = smov 64   ;;  %v384_v62 = vld [vmem:[%s736_s0 + $0x6] ss:$16 sm:%s217_s5]   ;;  %s220_s9 = smov 12 }
  0x17   :  { %v201_v58 = vsel %vm6_vm0, %v381_v56, %v380_v55  ;;  %v382_v59 = vld [vmem:[%s736_s0 + $0x7] ss:$16 sm:%s203_s28]   ;;  %190 = vrot.lane.b32.xlu1 %v189_v57, %s430_s6  ;;  %s225_s10 = smov 48  ;;  %s230_s15 = smov 192 }
  0x18   :  { %v383_v60 = vld [vmem:[%s736_s0 + $0x7] ss:$16 sm:%s208_s29]   ;;  %v206_v61 = vsel %vm10_vm1, %v382_v59, %v201_v58  ;;  %v385_v0 = vld [vmem:[%s736_s0 + $0x6] ss:$16 sm:%s220_s9]   ;;  %s431_s16 = smov 56   ;;  %s239_s19 = smov 3 }
  0x19   :  { %v211_v63 = vsel %vm14_vm2, %v383_v60, %v206_v61  ;;  %v386_v1 = vld [vmem:[%s736_s0 + $0x6] ss:$16 sm:%s225_s10]   ;;  %v223_v2 = vsel %vm6_vm0, %v385_v0, %v384_v62  ;;  %s242_s20 = smov 12  ;;  %v388_v5 = vld [vmem:[%s736_s0 + $0x5] ss:$16 sm:%s239_s19]   ;;  %s247_s25 = smov 48 }
  0x1a   :  { %212 = vrot.lane.b32.xlu0 %v211_v63, %s431_s16  ;;  %v387_v3 = vld [vmem:[%s736_s0 + $0x6] ss:$16 sm:%s230_s15]   ;;  %v228_v4 = vsel %vm10_vm1, %v386_v1, %v223_v2  ;;  %s252_s26 = smov 192  ;;  %s261_s2 = smov 3 }
  0x1b   :  { %v389_v6 = vld [vmem:[%s736_s0 + $0x5] ss:$16 sm:%s242_s20]   ;;  %v233_v7 = vsel %vm14_vm2, %v387_v3, %v228_v4  ;;  %s432_s3 = smov 48   ;;  %v392_v12 = vld [vmem:[%s736_s0 + $0x4] ss:$16 sm:%s261_s2]   ;;  %s264_s6 = smov 12 }
  0x1c   :  { %v245_v8 = vsel %vm6_vm0, %v389_v6, %v388_v5  ;;  %v390_v9 = vld [vmem:[%s736_s0 + $0x5] ss:$16 sm:%s247_s25]   ;;  %234 = vrot.lane.b32.xlu1 %v233_v7, %s432_s3  ;;  %s269_s7 = smov 48  ;;  %s274_s12 = smov 192 }
  0x1d   :  { %v391_v10 = vld [vmem:[%s736_s0 + $0x5] ss:$16 sm:%s252_s26]   ;;  %v250_v11 = vsel %vm10_vm1, %v390_v9, %v245_v8  ;;  %v393_v14 = vld [vmem:[%s736_s0 + $0x4] ss:$16 sm:%s264_s6]   ;;  %s433_s13 = smov 40   ;;  %s283_s16 = smov 3 }
  0x1e   :  { %v255_v13 = vsel %vm14_vm2, %v391_v10, %v250_v11  ;;  %v394_v15 = vld [vmem:[%s736_s0 + $0x4] ss:$16 sm:%s269_s7]   ;;  %v267_v16 = vsel %vm6_vm0, %v393_v14, %v392_v12  ;;  %s286_s17 = smov 12  ;;  %v396_v19 = vld [vmem:[%s736_s0 + $0x3] ss:$16 sm:%s283_s16]   ;;  %s291_s22 = smov 48 }
  0x1f   :  { %256 = vrot.lane.b32.xlu0 %v255_v13, %s433_s13  ;;  %v395_v17 = vld [vmem:[%s736_s0 + $0x4] ss:$16 sm:%s274_s12]   ;;  %v272_v18 = vsel %vm10_vm1, %v394_v15, %v267_v16  ;;  %s296_s23 = smov 192  ;;  %s305_s28 = smov 3 }
  0x20   :  { %v397_v20 = vld [vmem:[%s736_s0 + $0x3] ss:$16 sm:%s286_s17]   ;;  %v277_v21 = vsel %vm14_vm2, %v395_v17, %v272_v18  ;;  %s434_s29 = smov 32   ;;  %v400_v26 = vld [vmem:[%s736_s0 + $0x2] ss:$16 sm:%s305_s28]   ;;  %s308_s3 = smov 12 }
  0x21   :  { %v289_v22 = vsel %vm6_vm0, %v397_v20, %v396_v19  ;;  %v398_v23 = vld [vmem:[%s736_s0 + $0x3] ss:$16 sm:%s291_s22]   ;;  %278 = vrot.lane.b32.xlu1 %v277_v21, %s434_s29  ;;  %s313_s4 = smov 48  ;;  %s318_s9 = smov 192 }
  0x22   :  { %v399_v24 = vld [vmem:[%s736_s0 + $0x3] ss:$16 sm:%s296_s23]   ;;  %v294_v25 = vsel %vm10_vm1, %v398_v23, %v289_v22  ;;  %v401_v28 = vld [vmem:[%s736_s0 + $0x2] ss:$16 sm:%s308_s3]   ;;  %s435_s10 = smov 24   ;;  %s327_s13 = smov 3 }
  0x23   :  { %v299_v27 = vsel %vm14_vm2, %v399_v24, %v294_v25  ;;  %v402_v29 = vld [vmem:[%s736_s0 + $0x2] ss:$16 sm:%s313_s4]   ;;  %v311_v30 = vsel %vm6_vm0, %v401_v28, %v400_v26  ;;  %s330_s14 = smov 12  ;;  %v404_v33 = vld [vmem:[%s736_s0 + $0x1] ss:$16 sm:%s327_s13]   ;;  %s335_s19 = smov 48 }
  0x24   :  { %300 = vrot.lane.b32.xlu0 %v299_v27, %s435_s10  ;;  %v403_v31 = vld [vmem:[%s736_s0 + $0x2] ss:$16 sm:%s318_s9]   ;;  %v316_v32 = vsel %vm10_vm1, %v402_v29, %v311_v30  ;;  %s340_s20 = smov 192  ;;  %s2_s25 = smov 3 }
  0x25   :  { %v405_v34 = vld [vmem:[%s736_s0 + $0x1] ss:$16 sm:%s330_s14]   ;;  %v321_v35 = vsel %vm14_vm2, %v403_v31, %v316_v32  ;;  %s436_s26 = smov 16   ;;  %s4_s27 = smov 12  ;;  %v3_v40 = vld [vmem:[%s736_s0] ss:$16 sm:%s2_s25]  }
  0x26   :  { %v333_v36 = vsel %vm6_vm0, %v405_v34, %v404_v33  ;;  %v406_v37 = vld [vmem:[%s736_s0 + $0x1] ss:$16 sm:%s335_s19]   ;;  %322 = vrot.lane.b32.xlu1 %v321_v35, %s436_s26  ;;  %s8_s28 = smov 48  ;;  %s12_s2 = smov 192 }
  0x27   :  { %v407_v38 = vld [vmem:[%s736_s0 + $0x1] ss:$16 sm:%s340_s20]   ;;  %v338_v39 = vsel %vm10_vm1, %v406_v37, %v333_v36  ;;  %v5_v42 = vld [vmem:[%s736_s0] ss:$16 sm:%s4_s27]   ;;  %s437_s7 = smov 8  }
  0x28   :  { %v343_v41 = vsel %vm14_vm2, %v407_v38, %v338_v39  ;;  %v9_v43 = vld [vmem:[%s736_s0] ss:$16 sm:%s8_s28]   ;;  %v7_v44 = vsel %vm6_vm0, %v5_v42, %v3_v40  ;;  %vm302_vm0 = vcmask 261312  }
  0x29   :  { %344 = vrot.lane.b32.xlu0 %v343_v41, %s437_s7  ;;  %v13_v45 = vld [vmem:[%s736_s0] ss:$16 sm:%s12_s2]   ;;  %v11_v46 = vsel %vm10_vm1, %v9_v43, %v7_v44  ;;  %vm324_vm1 = vcmask 195712  }
  0x2a   :  { %v15_v47 = vsel %vm14_vm2, %v13_v45, %v11_v46  ;;  %vm346_vm2 = vcmask 130112  }
  0x2b   :  { %17 = vst.msk [vmem:[%s737_s1] sm:$0xff] %vm16_vm3, %v15_v47  }
  0x78   :  { %v37_v48 = vpop.permute.xlu0 %36  }
  0x79   :  { %39 = vst.msk [vmem:[%s737_s1] sm:$0xff] %vm38_vm4, %v37_v48  }
  0x7a   :  { %v81_v49 = vpop.permute.xlu1 %80  }
  0x7d   :  { %v59_v50 = vpop.permute.xlu0 %58  }
  0x7e   :  { %61 = vst.msk [vmem:[%s737_s1] sm:$0xff] %vm60_vm5, %v59_v50  }
  0x7f   :  { %83 = vst.msk [vmem:[%s737_s1] sm:$0xff] %vm82_vm6, %v81_v49   ;;  %v103_v51 = vpop.permute.xlu1 %102  }
  0x80   :  { %105 = vst.msk [vmem:[%s737_s1] sm:$0xff] %vm104_vm7, %v103_v51  }
  0x82   :  { %v125_v52 = vpop.permute.xlu0 %124  }
  0x83   :  { %127 = vst.msk [vmem:[%s737_s1] sm:$0xff] %vm126_vm8, %v125_v52  }
  0x84   :  { %v147_v53 = vpop.permute.xlu1 %146  }
  0x85   :  { %149 = vst.msk [vmem:[%s737_s1] sm:$0xff] %vm148_vm9, %v147_v53  }
  0x87   :  { %v169_v54 = vpop.permute.xlu0 %168  }
  0x88   :  { %171 = vst.msk [vmem:[%s737_s1] sm:$0xff] %vm170_vm10, %v169_v54  }
  0x89   :  { %v191_v55 = vpop.permute.xlu1 %190  }
  0x8a   :  { %193 = vst.msk [vmem:[%s737_s1] sm:$0xff] %vm192_vm11, %v191_v55  }
  0x8c   :  { %v213_v56 = vpop.permute.xlu0 %212  }
  0x8d   :  { %215 = vst.msk [vmem:[%s737_s1] sm:$0xff] %vm214_vm12, %v213_v56  }
  0x8e   :  { %v235_v57 = vpop.permute.xlu1 %234  }
  0x8f   :  { %237 = vst.msk [vmem:[%s737_s1] sm:$0xff] %vm236_vm13, %v235_v57  }
  0x91   :  { %v257_v58 = vpop.permute.xlu0 %256  }
  0x92   :  { %259 = vst.msk [vmem:[%s737_s1] sm:$0xff] %vm258_vm14, %v257_v58  }
  0x93   :  { %v279_v59 = vpop.permute.xlu1 %278  }
  0x94   :  { %281 = vst.msk [vmem:[%s737_s1] sm:$0xff] %vm280_vm15, %v279_v59  }
  0x96   :  { %v301_v60 = vpop.permute.xlu0 %300  }
  0x97   :  { %303 = vst.msk [vmem:[%s737_s1] sm:$0xff] %vm302_vm0, %v301_v60  }
  0x98   :  { %v323_v61 = vpop.permute.xlu1 %322  }
  0x99   :  { %325 = vst.msk [vmem:[%s737_s1] sm:$0xff] %vm324_vm1, %v323_v61  }
  0x9b   :  { %v345_v62 = vpop.permute.xlu0 %344  }
  0x9c   :  { %347 = vst.msk [vmem:[%s737_s1] sm:$0xff] %vm346_vm2, %v345_v62  }

// kernel: crimlp_forward_stacked.1
= control target key start
LH: loop header
LB: loop body
LE: loop exit
PB: predicated region body
PF: predicated region fallthrough
CT: control target
= control target key end

     0   :  { %vm52_vm0 = vcmask 64512   ;;  %vm1368_vm1 = vmmov 0   ;;  %vm970_vm2 = vcmask 7168   ;;  %s1842_s1 = inlined_call_operand.vmem [shape: f32[8,24], index: 1, kind: input, shape index: {}]   ;;  %s1843_s0 = inlined_call_operand.vmem [shape: f32[1,128,8], index: 0, kind: input, shape index: {}]   ;;  %s1844_s2 = inlined_call_operand.vmem [shape: f32[1,24], index: 2, kind: input, shape index: {}]   ;;  %s1845_s3 = inlined_call_operand.vmem [shape: f32[128,128], index: 3, kind: input, shape index: {}]   ;;  %s1846_s4 = inlined_call_operand.vmem [shape: f32[128,8], index: 4, kind: input, shape index: {}]   ;;  %s1847_s5 = inlined_call_operand.vmem [shape: f32[8,128], index: 5, kind: input, shape index: {}]   ;;  %s1848_s6 = inlined_call_operand.<no memory space> [shape: f32[1,1], index: 6, kind: input, shape index: {}]   ;;  %s1849_s7 = inlined_call_operand.vmem [shape: f32[1,8,1], index: 7, kind: output, shape index: {}]  }
   0x1   :  { %v44_v0 = vld [vmem:[%s1842_s1] sm:$0xff]  ;;  %v29_v2 = vld [vmem:[%s1843_s0 + $0x8] sm:$0xff]  ;;  %v30_v3 = vld [vmem:[%s1843_s0 + $0x10] sm:$0xff] }
   0x2   :  { %v28_v1 = vld [vmem:[%s1843_s0] sm:$0xff]  ;;  %1124 = vmatprep.subr.mxu0 %v44_v0  ;;  %v31_v4 = vld [vmem:[%s1843_s0 + $0x18] sm:$0xff]  ;;  %v33_v6 = vld [vmem:[%s1843_s0 + $0x28] sm:$0xff] }
   0x3   :  { %1126 = vmatprep.mubr.msk.f32.mxu0 %vm52_vm0, %v28_v1  ;;  %1125 = vmatpush3.msra.mxu0 %v44_v0  ;;  %v32_v5 = vld [vmem:[%s1843_s0 + $0x20] sm:$0xff]  ;;  %v34_v7 = vld [vmem:[%s1843_s0 + $0x30] sm:$0xff]  ;;  %v35_v8 = vld [vmem:[%s1843_s0 + $0x38] sm:$0xff] }
   0x4   :  { %1127 = vmatmul.mubr.msk.f32.vlgmr.msra.gmra.mxu0 %vm52_vm0, %v29_v2  ;;  %v36_v9 = vld [vmem:[%s1843_s0 + $0x40] sm:$0xff]  ;;  %v37_v10 = vld [vmem:[%s1843_s0 + $0x48] sm:$0xff]  ;;  %v38_v11 = vld [vmem:[%s1843_s0 + $0x50] sm:$0xff] }
   0x5   :  { %1129 = vmatprep.mubr.msk.f32.mxu0 %vm52_vm0, %v30_v3  ;;  %v39_v12 = vld [vmem:[%s1843_s0 + $0x58] sm:$0xff]  ;;  %v40_v13 = vld [vmem:[%s1843_s0 + $0x60] sm:$0xff]  ;;  %v41_v14 = vld [vmem:[%s1843_s0 + $0x68] sm:$0xff] }
   0x6   :  { %v42_v15 = vld [vmem:[%s1843_s0 + $0x70] sm:$0xff]  ;;  %v43_v16 = vld [vmem:[%s1843_s0 + $0x78] sm:$0xff]  ;;  %v976_v18 = vld [vmem:[%s1844_s2] ss:$0 sm:$0xff]  ;;  %s1365_s0 = smov 120   ;;  %s1366_s2 = smov 112  }
   0x8   :  { %1130 = vmatmul.mubr.msk.f32.gmra.mxu0 %vm52_vm0, %v31_v4 }
   0x9   :  { %1132 = vmatprep.mubr.msk.f32.mxu0 %vm52_vm0, %v32_v5 }
   0xc   :  { %1133 = vmatmul.mubr.msk.f32.gmra.mxu0 %vm52_vm0, %v33_v6 }
   0xd   :  { %1135 = vmatprep.mubr.msk.f32.mxu0 %vm52_vm0, %v34_v7 }
  0x10   :  { %1136 = vmatmul.mubr.msk.f32.gmra.mxu0 %vm52_vm0, %v35_v8 }
  0x11   :  { %1138 = vmatprep.mubr.msk.f32.mxu0 %vm52_vm0, %v36_v9 }
  0x14   :  { %1139 = vmatmul.mubr.msk.f32.gmra.mxu0 %vm52_vm0, %v37_v10 }
  0x15   :  { %1141 = vmatprep.mubr.msk.f32.mxu0 %vm52_vm0, %v38_v11 }
  0x18   :  { %1142 = vmatmul.mubr.msk.f32.gmra.mxu0 %vm52_vm0, %v39_v12 }
  0x19   :  { %1144 = vmatprep.mubr.msk.f32.mxu0 %vm52_vm0, %v40_v13 }
  0x1c   :  { %1145 = vmatmul.mubr.msk.f32.gmra.mxu0 %vm52_vm0, %v41_v14 }
  0x1d   :  { %1147 = vmatprep.mubr.msk.f32.mxu0 %vm52_vm0, %v42_v15 }
  0x20   :  { %1148 = vmatmul.mubr.msk.f32.gmra.mxu0 %vm52_vm0, %v43_v16 }
  0xc4   :  { %v1128_v17 = vpop.f32.mrf.mxu0 }
  0xc5   :  { %v1541_v49 = vadd.f32 %v1128_v17, %v976_v18  ;;  %v247_v17 = vld [vmem:[%s1845_s3 + $0x8] sm:$0xff] }
  0xc6   :  { %v167_v19 = vpop.f32.mrf.mxu0 }
  0xc7   :  { %v1479_v20 = vadd.f32 %v976_v18, %v167_v19  ;;  %v246_v19 = vld [vmem:[%s1845_s3] sm:$0xff] }
  0xc8   :  { %v1131_v21 = vpop.f32.mrf.mxu0 }
  0xc9   :  { %1182 = vmatprep.mubr.msk.f32.mxu1 %vm52_vm0, %v1479_v20  ;;  %v1535_v48 = vadd.f32 %v1131_v21, %v976_v18 }
  0xca   :  { %v177_v22 = vpop.f32.mrf.mxu0 }
  0xcb   :  { %v1527_v46 = vadd.f32 %v976_v18, %v177_v22 }
  0xcc   :  { %v1134_v23 = vpop.f32.mrf.mxu0 }
  0xcd   :  { %v1529_v47 = vadd.f32 %v1134_v23, %v976_v18  ;;  %v249_v23 = vld [vmem:[%s1845_s3 + $0x18] sm:$0xff] }
  0xce   :  { %v187_v24 = vpop.f32.mrf.mxu0 }
  0xcf   :  { %v1519_v44 = vadd.f32 %v976_v18, %v187_v24 }
  0xd0   :  { %v1137_v25 = vpop.f32.mrf.mxu0 }
  0xd1   :  { %v1521_v45 = vadd.f32 %v1137_v25, %v976_v18 }
  0xd2   :  { %v197_v26 = vpop.f32.mrf.mxu0 }
  0xd3   :  { %v1511_v42 = vadd.f32 %v976_v18, %v197_v26  ;;  %v248_v26 = vld [vmem:[%s1845_s3 + $0x10] sm:$0xff] }
  0xd4   :  { %v1140_v27 = vpop.f32.mrf.mxu0 }
  0xd5   :  { %v1513_v43 = vadd.f32 %v1140_v27, %v976_v18 }
  0xd6   :  { %v207_v28 = vpop.f32.mrf.mxu0 }
  0xd7   :  { %v1503_v40 = vadd.f32 %v976_v18, %v207_v28 }
  0xd8   :  { %v1143_v29 = vpop.f32.mrf.mxu0 }
  0xd9   :  { %v1505_v41 = vadd.f32 %v1143_v29, %v976_v18  ;;  %v251_v29 = vld [vmem:[%s1845_s3 + $0x28] sm:$0xff] }
  0xda   :  { %v217_v30 = vpop.f32.mrf.mxu0 }
  0xdb   :  { %v1495_v38 = vadd.f32 %v976_v18, %v217_v30 }
  0xdc   :  { %v1146_v31 = vpop.f32.mrf.mxu0 }
  0xdd   :  { %v1483_v32 = vadd.f32 %v1146_v31, %v976_v18 }
  0xde   :  { %v227_v33 = vpop.f32.mrf.mxu0 }
  0xdf   :  { %304 = vrot.lane.b32.xlu1 %v1483_v32, %s1365_s0  ;;  %v1487_v35 = vadd.f32 %v976_v18, %v227_v33 }
  0xe0   :  { %v1149_v34 = vpop.f32.mrf.mxu0 }
  0xe1   :  { %v1489_v36 = vadd.f32 %v1149_v34, %v976_v18 }
  0xe2   :  { %v237_v37 = vpop.f32.mrf.mxu0 }
  0xe3   :  { %308 = vrot.lane.b32.xlu0 %v1489_v36, %s1365_s0  ;;  %302 = vrot.lane.b32.xlu1 %v1487_v35, %s1365_s0  ;;  %v1497_v39 = vadd.f32 %v976_v18, %v237_v37 }
  0xe7   :  { %306 = vrot.lane.b32.xlu0 %v1497_v39, %s1365_s0  ;;  %298 = vrot.lane.b32.xlu1 %v1495_v38, %s1365_s0 }
  0xeb   :  { %300 = vrot.lane.b32.xlu0 %v1505_v41, %s1365_s0  ;;  %294 = vrot.lane.b32.xlu1 %v1503_v40, %s1365_s0 }
  0xef   :  { %296 = vrot.lane.b32.xlu0 %v1513_v43, %s1365_s0  ;;  %290 = vrot.lane.b32.xlu1 %v1511_v42, %s1365_s0 }
  0xf3   :  { %292 = vrot.lane.b32.xlu0 %v1521_v45, %s1365_s0  ;;  %286 = vrot.lane.b32.xlu1 %v1519_v44, %s1365_s0 }
  0xf7   :  { %288 = vrot.lane.b32.xlu0 %v1529_v47, %s1365_s0  ;;  %282 = vrot.lane.b32.xlu1 %v1527_v46, %s1365_s0 }
  0xfb   :  { %284 = vrot.lane.b32.xlu0 %v1535_v48, %s1365_s0  ;;  %278 = vrot.lane.b32.xlu1 %v1479_v20, %s1365_s0 }
  0xff   :  { %280 = vrot.lane.b32.xlu0 %v1541_v49, %s1365_s0  ;;  %657 = vrot.lane.b32.xlu1 %v1483_v32, %s1366_s2 }
 0x103   :  { %661 = vrot.lane.b32.xlu0 %v1489_v36, %s1366_s2  ;;  %653 = vrot.lane.b32.xlu1 %v1505_v41, %s1366_s2 }
 0x107   :  { %655 = vrot.lane.b32.xlu0 %v1487_v35, %s1366_s2  ;;  %649 = vrot.lane.b32.xlu1 %v1513_v43, %s1366_s2 }
 0x10b   :  { %651 = vrot.lane.b32.xlu0 %v1495_v38, %s1366_s2  ;;  %645 = vrot.lane.b32.xlu1 %v1521_v45, %s1366_s2 }
 0x10f   :  { %647 = vrot.lane.b32.xlu0 %v1503_v40, %s1366_s2  ;;  %641 = vrot.lane.b32.xlu1 %v1529_v47, %s1366_s2 }
 0x113   :  { %643 = vrot.lane.b32.xlu0 %v1511_v42, %s1366_s2  ;;  %637 = vrot.lane.b32.xlu1 %v1535_v48, %s1366_s2 }
 0x117   :  { %639 = vrot.lane.b32.xlu0 %v1519_v44, %s1366_s2  ;;  %633 = vrot.lane.b32.xlu1 %v1541_v49, %s1366_s2 }
 0x11b   :  { %635 = vrot.lane.b32.xlu0 %v1527_v46, %s1366_s2 }
 0x11f   :  { %659 = vrot.lane.b32.xlu0 %v1497_v39, %s1366_s2 }
 0x151   :  { %v305_v51 = vpop.permute.xlu1 %304 }
 0x155   :  { %v309_v50 = vpop.permute.xlu0 %308  ;;  %v303_v53 = vpop.permute.xlu1 %302 }
 0x156   :  { %1150 = vmatprep.subr.msk.mxu1 %vm52_vm0, %v309_v50 }
 0x157   :  { %1151 = vmatpush3.xpose.msk.msra.mxu1 %vm52_vm0, %v309_v50  ;;  %v256_v50 = vld [vmem:[%s1845_s3 + $0x50] sm:$0xff] }
 0x159   :  { %v307_v52 = vpop.permute.xlu0 %306  ;;  %v299_v56 = vpop.permute.xlu1 %298 }
 0x15a   :  { %1152 = vmatprep.subr.msk.mxu1 %vm52_vm0, %v307_v52 }
 0x15b   :  { %1153 = vmatpush3.xpose.msk.msra.mxu1 %vm52_vm0, %v307_v52 }
 0x15c   :  { %1154 = vmatprep.subr.msk.mxu1 %vm52_vm0, %v305_v51 }
 0x15d   :  { %v301_v54 = vpop.permute.xlu0 %300  ;;  %v295_v58 = vpop.permute.xlu1 %294 }
 0x15f   :  { %1155 = vmatpush3.xpose.msk.msra.mxu1 %vm52_vm0, %v305_v51 }
 0x160   :  { %1156 = vmatprep.subr.msk.mxu1 %vm52_vm0, %v303_v53 }
 0x161   :  { %v297_v55 = vpop.permute.xlu0 %296  ;;  %v291_v61 = vpop.permute.xlu1 %290 }
 0x163   :  { %1157 = vmatpush3.xpose.msk.msra.mxu1 %vm52_vm0, %v303_v53  ;;  %v259_v53 = vld [vmem:[%s1845_s3 + $0x68] sm:$0xff] }
 0x164   :  { %1158 = vmatprep.subr.msk.mxu1 %vm52_vm0, %v301_v54 }
 0x165   :  { %v293_v57 = vpop.permute.xlu0 %292  ;;  %v287_v63 = vpop.permute.xlu1 %286 }
 0x167   :  { %1159 = vmatpush3.xpose.msk.msra.mxu1 %vm52_vm0, %v301_v54 }
 0x168   :  { %1160 = vmatprep.subr.msk.mxu1 %vm52_vm0, %v299_v56 }
 0x169   :  { %v289_v59 = vpop.permute.xlu0 %288  ;;  %v283_v2 = vpop.permute.xlu1 %282 }
 0x16b   :  { %1161 = vmatpush3.xpose.msk.msra.mxu1 %vm52_vm0, %v299_v56  ;;  %v258_v56 = vld [vmem:[%s1845_s3 + $0x60] sm:$0xff] }
 0x16c   :  { %1162 = vmatprep.subr.msk.mxu1 %vm52_vm0, %v297_v55 }
 0x16d   :  { %v285_v60 = vpop.permute.xlu0 %284  ;;  %v279_v4 = vpop.permute.xlu1 %278 }
 0x16f   :  { %1163 = vmatpush3.xpose.msk.msra.mxu1 %vm52_vm0, %v297_v55 }
 0x170   :  { %1164 = vmatprep.subr.msk.mxu1 %vm52_vm0, %v295_v58 }
 0x171   :  { %v281_v62 = vpop.permute.xlu0 %280  ;;  %v658_v7 = vpop.permute.xlu1 %657 }
 0x173   :  { %1165 = vmatpush3.xpose.msk.msra.mxu1 %vm52_vm0, %v295_v58 }
 0x174   :  { %1166 = vmatprep.subr.msk.mxu1 %vm52_vm0, %v293_v57 }
 0x175   :  { %v662_v0 = vpop.permute.xlu0 %661  ;;  %v654_v9 = vpop.permute.xlu1 %653 }
 0x176   :  { %1206 = vmatprep.subr.mxu0 %v662_v0 }
 0x177   :  { %1167 = vmatpush3.xpose.msk.msra.mxu1 %vm52_vm0, %v293_v57  ;;  %1207 = vmatpush3.msra.mxu0 %v662_v0 }
 0x178   :  { %1168 = vmatprep.subr.msk.mxu1 %vm52_vm0, %v291_v61 }
 0x179   :  { %v656_v1 = vpop.permute.xlu0 %655  ;;  %v650_v12 = vpop.permute.xlu1 %649 }
 0x17b   :  { %1169 = vmatpush3.xpose.msk.msra.mxu1 %vm52_vm0, %v291_v61 }
 0x17c   :  { %1170 = vmatprep.subr.msk.mxu1 %vm52_vm0, %v289_v59 }
 0x17d   :  { %v652_v3 = vpop.permute.xlu0 %651  ;;  %v646_v13 = vpop.permute.xlu1 %645 }
 0x17f   :  { %1171 = vmatpush3.xpose.msk.msra.mxu1 %vm52_vm0, %v289_v59  ;;  %v261_v59 = vld [vmem:[%s1845_s3 + $0x78] sm:$0xff] }
 0x180   :  { %1172 = vmatprep.subr.msk.mxu1 %vm52_vm0, %v287_v63 }
 0x181   :  { %v648_v5 = vpop.permute.xlu0 %647  ;;  %v642_v14 = vpop.permute.xlu1 %641 }
 0x183   :  { %1173 = vmatpush3.xpose.msk.msra.mxu1 %vm52_vm0, %v287_v63 }
 0x184   :  { %1174 = vmatprep.subr.msk.mxu1 %vm52_vm0, %v285_v60 }
 0x185   :  { %v644_v6 = vpop.permute.xlu0 %643  ;;  %v638_v15 = vpop.permute.xlu1 %637 }
 0x187   :  { %1175 = vmatpush3.xpose.msk.msra.mxu1 %vm52_vm0, %v285_v60 }
 0x188   :  { %1176 = vmatprep.subr.msk.mxu1 %vm52_vm0, %v283_v2 }
 0x189   :  { %v640_v8 = vpop.permute.xlu0 %639  ;;  %v634_v16 = vpop.permute.xlu1 %633 }
 0x18b   :  { %1177 = vmatpush3.xpose.msk.msra.mxu1 %vm52_vm0, %v283_v2 }
 0x18c   :  { %1178 = vmatprep.subr.msk.mxu1 %vm52_vm0, %v281_v62 }
 0x18d   :  { %v636_v10 = vpop.permute.xlu0 %635 }
 0x18f   :  { %1179 = vmatpush3.xpose.msk.msra.mxu1 %vm52_vm0, %v281_v62  ;;  %v260_v62 = vld [vmem:[%s1845_s3 + $0x70] sm:$0xff] }
 0x190   :  { %1180 = vmatprep.subr.msk.mxu1 %vm52_vm0, %v279_v4 }
 0x191   :  { %v660_v11 = vpop.permute.xlu0 %659 }
 0x192   :  { %1208 = vmatprep.subr.mxu0 %v660_v11 }
 0x193   :  { %1181 = vmatpush3.xpose.msk.msra.mxu1 %vm52_vm0, %v279_v4  ;;  %1209 = vmatpush3.msra.mxu0 %v660_v11 }
 0x194   :  { %1210 = vmatprep.subr.mxu0 %v658_v7 }
 0x195   :  { %1211 = vmatpush3.msra.mxu0 %v658_v7 }
 0x196   :  { %1183 = vmatmul.mubr.msk.f32.vlgmr.msra.gmra.mxu1 %vm52_vm0, %v1541_v49  ;;  %1212 = vmatprep.subr.mxu0 %v656_v1 }
 0x197   :  { %1185 = vmatprep.mubr.msk.f32.mxu1 %vm52_vm0, %v1527_v46  ;;  %1213 = vmatpush3.msra.mxu0 %v656_v1 }
 0x198   :  { %1214 = vmatprep.subr.mxu0 %v654_v9 }
 0x199   :  { %1215 = vmatpush3.msra.mxu0 %v654_v9 }
 0x19a   :  { %1186 = vmatmul.mubr.msk.f32.gmra.mxu1 %vm52_vm0, %v1535_v48  ;;  %1216 = vmatprep.subr.mxu0 %v652_v3 }
 0x19b   :  { %1188 = vmatprep.mubr.msk.f32.mxu1 %vm52_vm0, %v1519_v44  ;;  %1217 = vmatpush3.msra.mxu0 %v652_v3  ;;  %v254_v44 = vld [vmem:[%s1845_s3 + $0x40] sm:$0xff] }
 0x19c   :  { %1218 = vmatprep.subr.mxu0 %v650_v12 }
 0x19d   :  { %1219 = vmatpush3.msra.mxu0 %v650_v12 }
 0x19e   :  { %1189 = vmatmul.mubr.msk.f32.gmra.mxu1 %vm52_vm0, %v1529_v47  ;;  %1220 = vmatprep.subr.mxu0 %v648_v5  ;;  %v257_v47 = vld [vmem:[%s1845_s3 + $0x58] sm:$0xff] }
 0x19f   :  { %1191 = vmatprep.mubr.msk.f32.mxu1 %vm52_vm0, %v1511_v42  ;;  %1221 = vmatpush3.msra.mxu0 %v648_v5 }
 0x1a0   :  { %1222 = vmatprep.subr.mxu0 %v646_v13 }
 0x1a1   :  { %1223 = vmatpush3.msra.mxu0 %v646_v13 }
 0x1a2   :  { %1192 = vmatmul.mubr.msk.f32.gmra.mxu1 %vm52_vm0, %v1521_v45  ;;  %1224 = vmatprep.subr.mxu0 %v644_v6 }
 0x1a3   :  { %1194 = vmatprep.mubr.msk.f32.mxu1 %vm52_vm0, %v1503_v40  ;;  %1225 = vmatpush3.msra.mxu0 %v644_v6 }
 0x1a4   :  { %1226 = vmatprep.subr.mxu0 %v642_v14 }
 0x1a5   :  { %1227 = vmatpush3.msra.mxu0 %v642_v14 }
 0x1a6   :  { %1195 = vmatmul.mubr.msk.f32.gmra.mxu1 %vm52_vm0, %v1513_v43  ;;  %1228 = vmatprep.subr.mxu0 %v640_v8 }
 0x1a7   :  { %1197 = vmatprep.mubr.msk.f32.mxu1 %vm52_vm0, %v1495_v38  ;;  %1229 = vmatpush3.msra.mxu0 %v640_v8  ;;  %v252_v38 = vld [vmem:[%s1845_s3 + $0x30] sm:$0xff] }
 0x1a8   :  { %1230 = vmatprep.subr.mxu0 %v638_v15 }
 0x1a9   :  { %1231 = vmatpush3.msra.mxu0 %v638_v15 }
 0x1aa   :  { %1198 = vmatmul.mubr.msk.f32.gmra.mxu1 %vm52_vm0, %v1505_v41  ;;  %1232 = vmatprep.subr.mxu0 %v636_v10  ;;  %v255_v41 = vld [vmem:[%s1845_s3 + $0x48] sm:$0xff] }
 0x1ab   :  { %1200 = vmatprep.mubr.msk.f32.mxu1 %vm52_vm0, %v1487_v35  ;;  %1233 = vmatpush3.msra.mxu0 %v636_v10  ;;  %v253_v35 = vld [vmem:[%s1845_s3 + $0x38] sm:$0xff] }
 0x1ac   :  { %1234 = vmatprep.subr.mxu0 %v634_v16 }
 0x1ad   :  { %1235 = vmatpush3.msra.mxu0 %v634_v16 }
 0x1ae   :  { %1201 = vmatmul.mubr.msk.f32.gmra.mxu1 %vm52_vm0, %v1483_v32  ;;  %v250_v32 = vld [vmem:[%s1845_s3 + $0x20] sm:$0xff] }
 0x1af   :  { %1203 = vmatprep.mubr.msk.f32.mxu1 %vm52_vm0, %v1497_v39 }
 0x1b2   :  { %1204 = vmatmul.mubr.msk.f32.gmra.mxu1 %vm52_vm0, %v1489_v36 }
 0x256   :  { %v1184_v18 = vpop.f32.mrf.mxu1 }
 0x257   :  { %v1643_v21 = vadd.f32 %v1184_v18, %v247_v17 }
 0x258   :  { %v440_v22 = vpop.f32.mrf.mxu1 }
 0x259   :  { %v1648_v24 = vadd.f32 %v440_v22, %v246_v19  ;;  %521 = vmax.xlane.f32.xlu0 %v1643_v21 }
 0x25a   :  { %v1187_v25 = vpop.f32.mrf.mxu1 }
 0x25b   :  { %v1654_v27 = vadd.f32 %v1187_v25, %v249_v23  ;;  %519 = vmax.xlane.f32.xlu1 %v1648_v24 }
 0x25c   :  { %v450_v28 = vpop.f32.mrf.mxu1 }
 0x25d   :  { %v1660_v30 = vadd.f32 %v450_v28, %v248_v26  ;;  %525 = vmax.xlane.f32.xlu0 %v1654_v27 }
 0x25e   :  { %v1190_v31 = vpop.f32.mrf.mxu1 }
 0x25f   :  { %v1666_v33 = vadd.f32 %v1190_v31, %v251_v29  ;;  %523 = vmax.xlane.f32.xlu1 %v1660_v30 }
 0x260   :  { %v460_v34 = vpop.f32.mrf.mxu1 }
 0x261   :  { %v1672_v36 = vadd.f32 %v460_v34, %v250_v32  ;;  %529 = vmax.xlane.f32.xlu0 %v1666_v33 }
 0x262   :  { %v1193_v37 = vpop.f32.mrf.mxu1 }
 0x263   :  { %v1678_v39 = vadd.f32 %v1193_v37, %v253_v35  ;;  %527 = vmax.xlane.f32.xlu1 %v1672_v36 }
 0x264   :  { %v470_v40 = vpop.f32.mrf.mxu1 }
 0x265   :  { %v1684_v42 = vadd.f32 %v470_v40, %v252_v38  ;;  %533 = vmax.xlane.f32.xlu0 %v1678_v39 }
 0x266   :  { %v1196_v43 = vpop.f32.mrf.mxu1 }
 0x267   :  { %v486_v45 = vadd.f32 %v1196_v43, %v255_v41  ;;  %531 = vmax.xlane.f32.xlu1 %v1684_v42 }
 0x268   :  { %v480_v46 = vpop.f32.mrf.mxu1 }
 0x269   :  { %v481_v48 = vadd.f32 %v480_v46, %v254_v44  ;;  %537 = vmax.xlane.f32.xlu0 %v486_v45 }
 0x26a   :  { %v1199_v49 = vpop.f32.mrf.mxu1 }
 0x26b   :  { %v496_v51 = vadd.f32 %v1199_v49, %v257_v47  ;;  %535 = vmax.xlane.f32.xlu1 %v481_v48 }
 0x26c   :  { %v490_v52 = vpop.f32.mrf.mxu1 }
 0x26d   :  { %v1700_v54 = vadd.f32 %v490_v52, %v256_v50  ;;  %541 = vmax.xlane.f32.xlu0 %v496_v51 }
 0x26e   :  { %v1202_v55 = vpop.f32.mrf.mxu1 }
 0x26f   :  { %v1705_v57 = vadd.f32 %v1202_v55, %v259_v53  ;;  %539 = vmax.xlane.f32.xlu1 %v1700_v54 }
 0x270   :  { %v500_v58 = vpop.f32.mrf.mxu1 }
 0x271   :  { %v1711_v60 = vadd.f32 %v500_v58, %v258_v56  ;;  %545 = vmax.xlane.f32.xlu0 %v1705_v57 }
 0x272   :  { %v1205_v61 = vpop.f32.mrf.mxu1 }
 0x273   :  { %v1717_v63 = vadd.f32 %v1205_v61, %v261_v59  ;;  %543 = vmax.xlane.f32.xlu1 %v1711_v60 }
 0x274   :  { %v510_v0 = vpop.f32.mrf.mxu1 }
 0x275   :  { %v1720_v1 = vadd.f32 %v510_v0, %v260_v62  ;;  %549 = vmax.xlane.f32.xlu0 %v1717_v63 }
 0x277   :  { %547 = vmax.xlane.f32.xlu1 %v1720_v1 }
 0x28b   :  { %631 = vrot.lane.b32.xlu0 %v1479_v20, %s1366_s2 }
 0x2e2   :  { %v522_v2 = vpop.xlane.xlu0 %521 }
 0x2e3   :  { %v552_v10 = vsub.f32 %v1643_v21, %v522_v2 }
 0x2e4   :  { %v520_v3 = vpop.xlane.xlu1 %519 }
 0x2e5   :  { %v551_v4 = vsub.f32 %v1648_v24, %v520_v3  ;;  %v569_v14 = vmul.f32 1.442695, %v552_v10  ;;  %v1367_v3 = vmov 0.0  }
 0x2e6   :  { %v526_v5 = vpop.xlane.xlu0 %525 }
 0x2e7   :  { %v567_v6 = vmul.f32 1.442695, %v551_v4  ;;  %v554_v15 = vsub.f32 %v1654_v27, %v526_v5 }
 0x2e8   :  { %v524_v7 = vpop.xlane.xlu1 %523 }
 0x2e9   :  { %1301 = vpow2.f32 %v567_v6  ;;  %v553_v12 = vsub.f32 %v1660_v30, %v524_v7  ;;  %v573_v25 = vmul.f32 1.442695, %v554_v15 }
 0x2ea   :  { %v530_v8 = vpop.xlane.xlu0 %529  ;;  %1303 = vpow2.f32 %v569_v14 }
 0x2eb   :  { %v571_v17 = vmul.f32 1.442695, %v553_v12  ;;  %v556_v26 = vsub.f32 %v1666_v33, %v530_v8 }
 0x2ec   :  { %v528_v9 = vpop.xlane.xlu1 %527 }
 0x2ed   :  { %v555_v18 = vsub.f32 %v1672_v36, %v528_v9  ;;  %v577_v36 = vmul.f32 1.442695, %v556_v26 }
 0x2ee   :  { %v534_v11 = vpop.xlane.xlu0 %533 }
 0x2ef   :  { %v575_v27 = vmul.f32 1.442695, %v555_v18  ;;  %v558_v37 = vsub.f32 %v1678_v39, %v534_v11 }
 0x2f0   :  { %v532_v13 = vpop.xlane.xlu1 %531 }
 0x2f1   :  { %v557_v30 = vsub.f32 %v1684_v42, %v532_v13  ;;  %v581_v42 = vmul.f32 1.442695, %v558_v37 }
 0x2f2   :  { %v538_v20 = vpop.xlane.xlu0 %537 }
 0x2f3   :  { %v560_v16 = vsub.f32 %v486_v45, %v538_v20  ;;  %v579_v33 = vmul.f32 1.442695, %v557_v30 }
 0x2f4   :  { %v536_v19 = vpop.xlane.xlu1 %535 }
 0x2f5   :  { %v585_v22 = vmul.f32 1.442695, %v560_v16  ;;  %v559_v23 = vsub.f32 %v481_v48, %v536_v19 }
 0x2f6   :  { %v1731_v24 = vpop.eup %1301  ;;  %v542_v21 = vpop.xlane.xlu0 %541 }
 0x2f7   :  { %1305 = vpow2.f32 %v585_v22  ;;  %v583_v28 = vmul.f32 1.442695, %v559_v23  ;;  %v562_v29 = vsub.f32 %v496_v51, %v542_v21  ;;  %1238 = vmatprep.mubr.f32.mxu0 %v1731_v24  ;;  %v1304_v47 = vpop.eup %1303 }
 0x2f8   :  { %1307 = vpow2.f32 %v571_v17  ;;  %v540_v31 = vpop.xlane.xlu1 %539 }
 0x2f9   :  { %1309 = vpow2.f32 %v583_v28  ;;  %v589_v32 = vmul.f32 1.442695, %v562_v29  ;;  %v561_v34 = vsub.f32 %v1700_v54, %v540_v31 }
 0x2fa   :  { %v546_v35 = vpop.xlane.xlu0 %545  ;;  %1311 = vpow2.f32 %v573_v25 }
 0x2fb   :  { %1313 = vpow2.f32 %v575_v27  ;;  %v587_v38 = vmul.f32 1.442695, %v561_v34  ;;  %v564_v40 = vsub.f32 %v1705_v57, %v546_v35  ;;  %v871_v34 = vld [vmem:[%s1846_s4 + $0x78] sm:$0xff] }
 0x2fc   :  { %1315 = vpow2.f32 %v589_v32  ;;  %v544_v41 = vpop.xlane.xlu1 %543 }
 0x2fd   :  { %1317 = vpow2.f32 %v577_v36  ;;  %v593_v44 = vmul.f32 1.442695, %v564_v40  ;;  %v563_v45 = vsub.f32 %v1711_v60, %v544_v41 }
 0x2fe   :  { %v550_v43 = vpop.xlane.xlu0 %549  ;;  %1319 = vpow2.f32 %v579_v33 }
 0x2ff   :  { %1321 = vpow2.f32 %v587_v38  ;;  %v591_v49 = vmul.f32 1.442695, %v563_v45  ;;  %v566_v50 = vsub.f32 %v1717_v63, %v550_v43  ;;  %v870_v38 = vld [vmem:[%s1846_s4 + $0x70] sm:$0xff]  ;;  %v869_v45 = vld [vmem:[%s1846_s4 + $0x68] sm:$0xff] }
 0x300   :  { %1323 = vpow2.f32 %v581_v42  ;;  %v548_v51 = vpop.xlane.xlu1 %547 }
 0x301   :  { %1325 = vpow2.f32 %v593_v44  ;;  %v565_v54 = vsub.f32 %v1720_v1, %v548_v51  ;;  %v597_v56 = vmul.f32 1.442695, %v566_v50 }
 0x302   :  { %v632_v46 = vpop.permute.xlu0 %631  ;;  %1327 = vpow2.f32 %v591_v49 }
 0x303   :  { %1236 = vmatprep.subr.mxu0 %v632_v46  ;;  %v595_v59 = vmul.f32 1.442695, %v565_v54  ;;  %1329 = vpow2.f32 %v597_v56 }
 0x304   :  { %v1306_v39 = vpop.eup %1305  ;;  %1237 = vmatpush3.msra.mxu0 %v632_v46 }
 0x305   :  { %v1308_v48 = vpop.eup %1307  ;;  %617 = vadd.xlane.f32.xlu0 %v1306_v39  ;;  %1239 = vmatmul.mubr.f32.vlgmr.msra.gmra.mxu0 %v1304_v47  ;;  %1331 = vpow2.f32 %v595_v59 }
 0x306   :  { %v1310_v52 = vpop.eup %1309  ;;  %1241 = vmatprep.mubr.f32.mxu0 %v1308_v48  ;;  %1262 = vmatprep.subr.mxu0 %v1367_v3 }
 0x307   :  { %615 = vadd.xlane.f32.xlu1 %v1310_v52  ;;  %v1312_v53 = vpop.eup %1311 }
 0x308   :  { %v1314_v55 = vpop.eup %1313 }
 0x309   :  { %601 = vadd.xlane.f32.xlu0 %v1304_v47  ;;  %1242 = vmatmul.mubr.f32.gmra.mxu0 %v1312_v53  ;;  %v1316_v57 = vpop.eup %1315 }
 0x30a   :  { %1244 = vmatprep.mubr.f32.mxu0 %v1314_v55  ;;  %v1318_v58 = vpop.eup %1317 }
 0x30b   :  { %621 = vadd.xlane.f32.xlu1 %v1316_v57  ;;  %v1320_v60 = vpop.eup %1319 }
 0x30c   :  { %v1322_v61 = vpop.eup %1321 }
 0x30d   :  { %1245 = vmatmul.mubr.f32.gmra.mxu0 %v1318_v58  ;;  %v1324_v62 = vpop.eup %1323 }
 0x30e   :  { %1247 = vmatprep.mubr.f32.mxu0 %v1320_v60  ;;  %v1326_v63 = vpop.eup %1325 }
 0x30f   :  { %619 = vadd.xlane.f32.xlu1 %v1322_v61  ;;  %v1328_v0 = vpop.eup %1327 }
 0x310   :  { %v1330_v1 = vpop.eup %1329 }
 0x311   :  { %1248 = vmatmul.mubr.f32.gmra.mxu0 %v1324_v62 }
 0x312   :  { %1250 = vmatprep.mubr.f32.mxu0 %v1310_v52  ;;  %v1332_v2 = vpop.eup %1331  ;;  %v867_v52 = vld [vmem:[%s1846_s4 + $0x58] sm:$0xff] }
 0x313   :  { %625 = vadd.xlane.f32.xlu1 %v1326_v63 }
 0x315   :  { %1251 = vmatmul.mubr.f32.gmra.mxu0 %v1306_v39 }
 0x316   :  { %1253 = vmatprep.mubr.f32.mxu0 %v1322_v61 }
 0x317   :  { %623 = vadd.xlane.f32.xlu1 %v1328_v0 }
 0x319   :  { %1254 = vmatmul.mubr.f32.gmra.mxu0 %v1316_v57 }
 0x31a   :  { %1256 = vmatprep.mubr.f32.mxu0 %v1328_v0 }
 0x31b   :  { %629 = vadd.xlane.f32.xlu1 %v1330_v1 }
 0x31d   :  { %1257 = vmatmul.mubr.f32.gmra.mxu0 %v1326_v63 }
 0x31e   :  { %1259 = vmatprep.mubr.f32.mxu0 %v1332_v2 }
 0x31f   :  { %627 = vadd.xlane.f32.xlu1 %v1332_v2  ;;  %v864_v2 = vld [vmem:[%s1846_s4 + $0x40] sm:$0xff] }
 0x321   :  { %1260 = vmatmul.mubr.f32.gmra.mxu0 %v1330_v1 }
 0x322   :  { %1294 = vmatprep.mubr.msk.f32.mxu0 %vm1368_vm1, %v1367_v3 }
 0x323   :  { %613 = vadd.xlane.f32.xlu1 %v1324_v62  ;;  %v865_v62 = vld [vmem:[%s1846_s4 + $0x48] sm:$0xff] }
 0x327   :  { %611 = vadd.xlane.f32.xlu1 %v1320_v60 }
 0x32b   :  { %609 = vadd.xlane.f32.xlu1 %v1318_v58  ;;  %v866_v58 = vld [vmem:[%s1846_s4 + $0x50] sm:$0xff] }
 0x32f   :  { %607 = vadd.xlane.f32.xlu1 %v1314_v55 }
 0x333   :  { %605 = vadd.xlane.f32.xlu1 %v1312_v53 }
 0x337   :  { %603 = vadd.xlane.f32.xlu1 %v1308_v48  ;;  %v868_v48 = vld [vmem:[%s1846_s4 + $0x60] sm:$0xff] }
 0x33b   :  { %599 = vadd.xlane.f32.xlu1 %v1731_v24 }
 0x38e   :  { %v618_v26 = vpop.xlane.xlu0 %617 }
 0x390   :  { %v616_v4 = vpop.xlane.xlu1 %615 }
 0x392   :  { %v602_v53 = vpop.xlane.xlu0 %601 }
 0x394   :  { %v622_v5 = vpop.xlane.xlu1 %621 }
 0x398   :  { %v620_v6 = vpop.xlane.xlu1 %619 }
 0x39c   :  { %v626_v7 = vpop.xlane.xlu1 %625 }
 0x3a0   :  { %v624_v8 = vpop.xlane.xlu1 %623 }
 0x3a4   :  { %v630_v9 = vpop.xlane.xlu1 %629 }
 0x3a5   :  { %1333 = vrcp.f32 %v630_v9 }
 0x3a6   :  { %1335 = vrcp.f32 %v626_v7  ;;  %v863_v7 = vld [vmem:[%s1846_s4 + $0x38] sm:$0xff] }
 0x3a8   :  { %v628_v10 = vpop.xlane.xlu1 %627 }
 0x3a9   :  { %1337 = vrcp.f32 %v628_v10 }
 0x3aa   :  { %1339 = vrcp.f32 %v624_v8 }
 0x3ab   :  { %1341 = vrcp.f32 %v622_v5 }
 0x3ac   :  { %v614_v12 = vpop.xlane.xlu1 %613  ;;  %1343 = vrcp.f32 %v620_v6 }
 0x3ad   :  { %1345 = vrcp.f32 %v618_v26  ;;  %v860_v26 = vld [vmem:[%s1846_s4 + $0x20] sm:$0xff] }
 0x3ae   :  { %1347 = vrcp.f32 %v616_v4 }
 0x3af   :  { %1349 = vrcp.f32 %v614_v12  ;;  %v862_v12 = vld [vmem:[%s1846_s4 + $0x30] sm:$0xff] }
 0x3b0   :  { %v612_v20 = vpop.xlane.xlu1 %611 }
 0x3b1   :  { %1351 = vrcp.f32 %v612_v20 }
 0x3b2   :  { %v1334_v31 = vpop.eup %1333 }
 0x3b3   :  { %v1336_v35 = vpop.eup %1335 }
 0x3b4   :  { %v610_v19 = vpop.xlane.xlu1 %609 }
 0x3b5   :  { %1353 = vrcp.f32 %v610_v19 }
 0x3b6   :  { %v1338_v37 = vpop.eup %1337 }
 0x3b7   :  { %v1340_v42 = vpop.eup %1339 }
 0x3b8   :  { %v608_v25 = vpop.xlane.xlu1 %607  ;;  %v1342_v39 = vpop.eup %1341 }
 0x3b9   :  { %1355 = vrcp.f32 %v608_v25  ;;  %v1344_v51 = vpop.eup %1343 }
 0x3ba   :  { %v1346_v56 = vpop.eup %1345 }
 0x3bb   :  { %v1348_v61 = vpop.eup %1347 }
 0x3bc   :  { %v606_v27 = vpop.xlane.xlu1 %605  ;;  %v1350_v1 = vpop.eup %1349 }
 0x3bd   :  { %1357 = vrcp.f32 %v606_v27 }
 0x3be   :  { %v1352_v6 = vpop.eup %1351 }
 0x3c0   :  { %v604_v44 = vpop.xlane.xlu1 %603 }
 0x3c1   :  { %1359 = vrcp.f32 %v604_v44 }
 0x3c2   :  { %1361 = vrcp.f32 %v602_v53  ;;  %v1354_v10 = vpop.eup %1353 }
 0x3c4   :  { %v600_v57 = vpop.xlane.xlu1 %599 }
 0x3c5   :  { %v1745_v11 = vpop.f32.mrf.mxu0  ;;  %1363 = vrcp.f32 %v600_v57 }
 0x3c6   :  { %v1356_v20 = vpop.eup %1355 }
 0x3c7   :  { %v1747_v13 = vpop.f32.mrf.mxu0 }
 0x3c9   :  { %v1749_v14 = vpop.f32.mrf.mxu0 }
 0x3cb   :  { %v1751_v15 = vpop.f32.mrf.mxu0 }
 0x3cd   :  { %v1753_v16 = vpop.f32.mrf.mxu0 }
 0x3cf   :  { %v1755_v17 = vpop.f32.mrf.mxu0 }
 0x3d1   :  { %v1757_v18 = vpop.f32.mrf.mxu0 }
 0x3d2   :  { %v839_v4 = vmul.f32 %v1350_v1, %v1757_v18  ;;  %v835_v18 = vmul.f32 %v1354_v10, %v1753_v16 }
 0x3d3   :  { %v1759_v22 = vpop.f32.mrf.mxu0 }
 0x3d4   :  { %v837_v8 = vmul.f32 %v1352_v6, %v1759_v22  ;;  %v879_v19 = vmul.f32 %v863_v7, %v839_v4  ;;  %v833_v22 = vmul.f32 %v1356_v20, %v1755_v17 }
 0x3d5   :  { %v1252_v23 = vpop.f32.mrf.mxu0 }
 0x3d6   :  { %v843_v59 = vmul.f32 %v1346_v56, %v1252_v23  ;;  %v1358_v23 = vpop.eup %1357  ;;  %v878_v25 = vmul.f32 %v862_v12, %v837_v8 }
 0x3d7   :  { %v785_v24 = vpop.f32.mrf.mxu0  ;;  %v831_v16 = vmul.f32 %v1358_v23, %v1749_v14 }
 0x3d8   :  { %v841_v63 = vmul.f32 %v1348_v61, %v785_v24  ;;  %v881_v5 = vmul.f32 %v865_v62, %v843_v59  ;;  %v861_v24 = vld [vmem:[%s1846_s4 + $0x28] sm:$0xff] }
 0x3d9   :  { %v1255_v21 = vpop.f32.mrf.mxu0 }
 0x3da   :  { %v847_v49 = vmul.f32 %v1342_v39, %v1255_v21  ;;  %v880_v9 = vmul.f32 %v864_v2, %v841_v63  ;;  %v1360_v21 = vpop.eup %1359 }
 0x3db   :  { %v795_v28 = vpop.f32.mrf.mxu0  ;;  %v1362_v17 = vpop.eup %1361  ;;  %v829_v27 = vmul.f32 %v1360_v21, %v1751_v15 }
 0x3dc   :  { %v845_v54 = vmul.f32 %v1344_v51, %v795_v28  ;;  %v883_v60 = vmul.f32 %v867_v52, %v847_v49  ;;  %v877_v28 = vmul.f32 %v861_v24, %v835_v18  ;;  %v827_v14 = vmul.f32 %v1362_v17, %v1745_v11 }
 0x3dd   :  { %v1258_v29 = vpop.f32.mrf.mxu0 }
 0x3de   :  { %v851_v40 = vmul.f32 %v1336_v35, %v1258_v29  ;;  %v882_v0 = vmul.f32 %v866_v58, %v845_v54  ;;  %v859_v29 = vld [vmem:[%s1846_s4 + $0x18] sm:$0xff]  ;;  %v857_v35 = vld [vmem:[%s1846_s4 + $0x8] sm:$0xff] }
 0x3df   :  { %v805_v30 = vpop.f32.mrf.mxu0 }
 0x3e0   :  { %v849_v46 = vmul.f32 %v1340_v42, %v805_v30  ;;  %v885_v50 = vmul.f32 %v869_v45, %v851_v40  ;;  %v876_v30 = vmul.f32 %v860_v26, %v833_v22 }
 0x3e1   :  { %v1261_v32 = vpop.f32.mrf.mxu0 }
 0x3e2   :  { %v855_v36 = vmul.f32 %v1334_v31, %v1261_v32  ;;  %v884_v55 = vmul.f32 %v868_v48, %v849_v46  ;;  %v1364_v31 = vpop.eup %1363  ;;  %v858_v32 = vld [vmem:[%s1846_s4 + $0x10] sm:$0xff] }
 0x3e3   :  { %v815_v33 = vpop.f32.mrf.mxu0  ;;  %v825_v15 = vmul.f32 %v1364_v31, %v1747_v13  ;;  %v12_v13 = vstv %s1848_s6 }
 0x3e4   :  { %v887_v41 = vmul.f32 %v871_v34, %v855_v36  ;;  %v853_v43 = vmul.f32 %v1338_v37, %v815_v33  ;;  %v875_v34 = vmul.f32 %v859_v29, %v831_v16  ;;  %v874_v36 = vmul.f32 %v858_v32, %v829_v27  ;;  %v856_v37 = vld [vmem:[%s1846_s4] sm:$0xff]  ;;  %13 = vst [vmem:[#allocation2] sm:$0x1] %v12_v13 }
 0x3e5   :  { %v873_v33 = vmul.f32 %v857_v35, %v827_v14  ;;  %v872_v11 = vmul.f32 %v856_v37, %v825_v15 }
 0x3e6   :  { %v886_v47 = vmul.f32 %v870_v38, %v853_v43  ;;  %1263 = vmatpush3.msra.mxu0 %v887_v41  ;;  %v888_v38 = vld [vmem:[%s1847_s5] sm:$0xff] }
 0x3e7   :  { %1264 = vmatprep.subr.mxu0 %v1367_v3 }
 0x3e8   :  { %1265 = vmatpush3.msra.mxu0 %v886_v47 }
 0x3e9   :  { %1266 = vmatprep.subr.mxu0 %v1367_v3 }
 0x3ea   :  { %1267 = vmatpush3.msra.mxu0 %v885_v50 }
 0x3eb   :  { %1268 = vmatprep.subr.mxu0 %v1367_v3  ;;  %v1025_v42 = vld [vmem:[#allocation2] ss:$0 sm:$0xff] }
 0x3ec   :  { %1269 = vmatpush3.msra.mxu0 %v884_v55 }
 0x3ed   :  { %1270 = vmatprep.subr.mxu0 %v1367_v3 }
 0x3ee   :  { %1271 = vmatpush3.msra.mxu0 %v883_v60 }
 0x3ef   :  { %1272 = vmatprep.subr.mxu0 %v1367_v3 }
 0x3f0   :  { %1273 = vmatpush3.msra.mxu0 %v882_v0 }
 0x3f1   :  { %1274 = vmatprep.subr.mxu0 %v1367_v3 }
 0x3f2   :  { %1275 = vmatpush3.msra.mxu0 %v881_v5 }
 0x3f3   :  { %1276 = vmatprep.subr.mxu0 %v1367_v3 }
 0x3f4   :  { %1277 = vmatpush3.msra.mxu0 %v880_v9 }
 0x3f5   :  { %1278 = vmatprep.subr.mxu0 %v1367_v3 }
 0x3f6   :  { %1279 = vmatpush3.msra.mxu0 %v879_v19 }
 0x3f7   :  { %1280 = vmatprep.subr.mxu0 %v1367_v3 }
 0x3f8   :  { %1281 = vmatpush3.msra.mxu0 %v878_v25 }
 0x3f9   :  { %1282 = vmatprep.subr.mxu0 %v1367_v3 }
 0x3fa   :  { %1283 = vmatpush3.msra.mxu0 %v877_v28 }
 0x3fb   :  { %1284 = vmatprep.subr.mxu0 %v1367_v3 }
 0x3fc   :  { %1285 = vmatpush3.msra.mxu0 %v876_v30 }
 0x3fd   :  { %1286 = vmatprep.subr.mxu0 %v1367_v3 }
 0x3fe   :  { %1287 = vmatpush3.msra.mxu0 %v875_v34 }
 0x3ff   :  { %1288 = vmatprep.subr.mxu0 %v1367_v3 }
 0x400   :  { %1289 = vmatpush3.msra.mxu0 %v874_v36 }
 0x401   :  { %1290 = vmatprep.subr.mxu0 %v1367_v3 }
 0x402   :  { %1291 = vmatpush3.msra.mxu0 %v873_v33 }
 0x403   :  { %1292 = vmatprep.subr.mxu0 %v1367_v3 }
 0x404   :  { %1293 = vmatpush3.msra.mxu0 %v872_v11 }
 0x405   :  { %1295 = vmatmul.mubr.f32.vlgmr.msra.gmra.mxu0 %v888_v38 }
 0x4c5   :  { %v955_v40 = vpop.f32.mrf.mxu0 }
 0x4c6   :  { %v959_v41 = vsel %vm52_vm0, %v955_v40, 0.0 }
 0x4c7   :  { %v1296_v43 = vpop.f32.mrf.mxu0  ;;  %960 = vadd.xlane.f32.xlu0 %v959_v41 }
 0x550   :  { %v961_v44 = vpop.xlane.xlu0 %960 }
 0x551   :  { %v969_v45 = vadd.f32 %v1025_v42, %v961_v44 }
 0x553   :  { %971 = vst.msk [vmem:[%s1849_s7] sm:$0xff] %vm970_vm2, %v969_v45 }

</bundles_post_ra>
